<compile_context>
chip_gen: v5e
topology: v5e:2x2
jax: 0.10.0
libtpu: 0.0.40
codegen_flags: <defaults>
</compile_context>

<pallas_src>
import math

import jax
import jax.numpy as jnp
from jax import lax
from jax.experimental import pallas as pl
from jax.experimental.pallas import tpu as pltpu


def _round_up(a, b):
    return (a + b - 1) // b * b


def _gelu_exact(x):
    # PyTorch nn.GELU() default is the exact erf formulation.
    # TODO(synk): if profiling ever shows VALU as the saturated slot, switch to
    # the tanh approximation (EUP slot) — numerics then differ slightly.
    return 0.5 * x * (1.0 + lax.erf(x * jnp.float32(1.0 / math.sqrt(2.0))))


def adapter_kernel(x_ref, w1_ref, b1_ref, w2_ref, b2_ref, o_ref):
    # fc1: native-dtype operands on the MXU, f32 accumulation.
    h = jnp.dot(x_ref[...], w1_ref[...], preferred_element_type=jnp.float32)
    h = _gelu_exact(h + b1_ref[...])                      # b1 is f32
    # fc2
    y = jnp.dot(h.astype(w2_ref.dtype), w2_ref[...],
                preferred_element_type=jnp.float32)
    y = y + b2_ref[...]                                   # b2 is f32
    # Skip connect: re-read x from the already-resident VMEM input buffer
    # instead of keeping the (tm, D) tile live across both matmuls.
    o_ref[...] = (x_ref[...].astype(jnp.float32) + y).astype(o_ref.dtype)


def _physical_vmem_bytes():
    try:
        return int(pltpu.get_tpu_info().vmem_capacity_bytes)
    except Exception:
        return 64 << 20    # conservative: v7x per-TensorCore VMEM


def _plan_tiles(N, D, Hp, itemsize, physical_vmem, weight_buffers,
                tm_user=None, max_tm=8192, min_grid_steps=4):
    """Choose the row tile so everything fits VMEM, and the matching limit."""
    sub = max(8, 32 // itemsize)                     # sublane packing: 8 f32, 16 bf16
    budget = physical_vmem * 3 // 4                  # headroom under physical VMEM
    # Resident weights/biases (weight_buffers = 1 if single-buffered, else 2).
    weight_bytes = weight_buffers * ((D * Hp + Hp * D) * itemsize + (Hp + D) * 4)
    # Per row: double-buffered x tile + double-buffered out tile (native dtype)
    # plus the f32 intermediates h (Hp) and y (D).
    per_row = 4 * D * itemsize + (Hp + D) * 4
    avail = max(budget - weight_bytes, sub * per_row)
    tm = max(sub, (avail // per_row) // sub * sub)
    tm = min(tm, max_tm)
    if tm_user is not None:
        tm = min(tm, max(sub, _round_up(tm_user, sub)))
    # Keep at least `min_grid_steps` grid steps when N allows: shards rows
    # across v7x's 2 TensorCores and keeps the DMA pipeline warm.
    if N > min_grid_steps * sub:
        tm = min(tm, _round_up(pl.cdiv(N, min_grid_steps), sub))
    tm = max(sub, min(tm, _round_up(N, sub)))
    # Rebalance so the tail tile is mostly full (bounds padding waste).
    n_tiles = pl.cdiv(N, tm)
    tm = max(sub, _round_up(pl.cdiv(N, n_tiles), sub))
    Np = _round_up(N, tm)
    needed = weight_bytes + tm * per_row
    vmem_limit = int(min(physical_vmem,
                         max(needed * 5 // 4 + (2 << 20), 32 << 20)))
    return tm, Np, Np // tm, vmem_limit


def adapter_forward(x, w1, b1, w2, b2, *, tm=None):
    """x: (..., D).  Returns x + (GELU(x @ w1 + b1) @ w2 + b2), same shape/dtype."""
    orig_shape = x.shape
    D = orig_shape[-1]
    H = w1.shape[1]
    x2 = x.reshape(-1, D)
    N = x2.shape[0]
    dtype = x2.dtype
    itemsize = jnp.dtype(dtype).itemsize

    # Match operand dtypes for the MXU (mixed bf16/f32 operands are slow).
    w1 = w1.astype(dtype)
    w2 = w2.astype(dtype)

    # Lane-pad hidden dim to a multiple of 128 so the (tm, Hp) intermediate is
    # lane-dense.  GELU(0)=0 and the extra W2 rows are zero, so results match.
    Hp = _round_up(H, 128)
    if Hp != H:
        w1 = jnp.pad(w1, ((0, 0), (0, Hp - H)))
        b1 = jnp.pad(b1, (0, Hp - H))
        w2 = jnp.pad(w2, ((0, Hp - H), (0, 0)))
    b1_2d = b1.astype(jnp.float32).reshape(1, Hp)
    b2_2d = b2.astype(jnp.float32).reshape(1, D)

    physical_vmem = _physical_vmem_bytes()

    def _run(single_buffer_weights):
        weight_buffers = 1 if single_buffer_weights else 2
        tm_eff, Np, steps, vmem_limit = _plan_tiles(
            N, D, Hp, itemsize, physical_vmem, weight_buffers, tm_user=tm)
        x_in = x2 if Np == N else jnp.pad(x2, ((0, Np - N), (0, 0)))
        # Grid-invariant operands: constant index_map, single-buffered if possible.
        wkw = dict(pipeline_mode=pl.Buffered(1)) if single_buffer_weights else {}
        return pl.pallas_call(
            adapter_kernel,
            out_shape=jax.ShapeDtypeStruct((Np, D), dtype),
            grid_spec=pltpu.PrefetchScalarGridSpec(
                num_scalar_prefetch=0,
                grid=(steps,),
                in_specs=[
                    pl.BlockSpec((tm_eff, D), lambda i: (i, 0)),       # x row tile
                    pl.BlockSpec((D, Hp), lambda i: (0, 0), **wkw),    # W1 (resident)
                    pl.BlockSpec((1, Hp), lambda i: (0, 0), **wkw),    # b1
                    pl.BlockSpec((Hp, D), lambda i: (0, 0), **wkw),    # W2 (resident)
                    pl.BlockSpec((1, D), lambda i: (0, 0), **wkw),     # b2
                ],
                out_specs=pl.BlockSpec((tm_eff, D), lambda i: (i, 0)),
            ),
            compiler_params=pltpu.CompilerParams(
                dimension_semantics=("parallel",),
                vmem_limit_bytes=vmem_limit),
        )(x_in, w1, b1_2d, w2, b2_2d)

    try:
        out = _run(True)        # single-buffer the grid-invariant weights/biases
    except Exception:           # Buffered(1) not supported -> default double-buffer
        out = _run(False)

    if out.shape[0] != N:
        out = out[:N]
    return out.reshape(orig_shape)


def init_adapter_params(key, d_features, mlp_ratio=0.25, dtype=jnp.float32):
    """Deterministic init mirroring nn.Linear shapes (W stored transposed: (in, out))."""
    H = int(d_features * mlp_ratio)
    k1, k2, k3, k4 = jax.random.split(key, 4)
    lim1 = 1.0 / math.sqrt(d_features)
    lim2 = 1.0 / math.sqrt(H)
    w1 = jax.random.uniform(k1, (d_features, H), dtype, -lim1, lim1)
    b1 = jax.random.uniform(k2, (H,), dtype, -lim1, lim1)
    w2 = jax.random.uniform(k3, (H, d_features), dtype, -lim2, lim2)
    b2 = jax.random.uniform(k4, (d_features,), dtype, -lim2, lim2)
    return w1, b1, w2, b2


def _reference(x, w1, b1, w2, b2):
    return x + (jax.nn.gelu(x @ w1 + b1, approximate=False) @ w2 + b2)


if __name__ == "__main__":
    key = jax.random.PRNGKey(0)
    kx, kp, kx2, kx3, kp3 = jax.random.split(key, 5)

    # 1) Small shapes consistent with the module: d_features=128, hidden=32.
    batch, seq, d_features = 2, 8, 128
    x = jax.random.normal(kx, (batch, seq, d_features), dtype=jnp.float32)
    w1, b1, w2, b2 = init_adapter_params(kp, d_features, mlp_ratio=0.25)
    out = jax.block_until_ready(adapter_forward(x, w1, b1, w2, b2))
    ref = _reference(x, w1, b1, w2, b2)
    assert out.shape == x.shape and out.dtype == x.dtype
    assert jnp.allclose(out, ref, atol=1e-4, rtol=1e-4)

    # 2) Ragged row count (exercises tail padding / rebalancing).
    x_ragged = jax.random.normal(kx2, (3, 7, d_features), dtype=jnp.float32)
    out_r = jax.block_until_ready(adapter_forward(x_ragged, w1, b1, w2, b2))
    ref_r = _reference(x_ragged, w1, b1, w2, b2)
    assert out_r.shape == x_ragged.shape
    assert jnp.allclose(out_r, ref_r, atol=1e-4, rtol=1e-4)

    # 3) Module-default width (d=768, hidden=192 -> lane-padded 256); N=392
    #    gives a multi-step grid (>=4), exercising the megacore/pipelined path.
    xb = jax.random.normal(kx3, (2, 196, 768), dtype=jnp.float32)
    w1b, b1b, w2b, b2b = init_adapter_params(kp3, 768, mlp_ratio=0.25)
    out_b = jax.block_until_ready(adapter_forward(xb, w1b, b1b, w2b, b2b))
    ref_b = _reference(xb, w1b, b1b, w2b, b2b)
    assert out_b.shape == xb.shape
    assert jnp.allclose(out_b, ref_b, atol=1e-3, rtol=1e-3)

    print("KERNEL_OK")
</pallas_src>

<mosaic_0001>
module attributes {stable_mosaic.version = 11 : i64} {
  func.func @adapter_kernel(%arg0: i32, %arg1: memref<16x128xf32, #tpu.memory_space<vmem>>, %arg2: memref<128x128xf32, #tpu.memory_space<vmem>>, %arg3: memref<1x128xf32, #tpu.memory_space<vmem>>, %arg4: memref<128x128xf32, #tpu.memory_space<vmem>>, %arg5: memref<1x128xf32, #tpu.memory_space<vmem>>, %arg6: memref<16x128xf32, #tpu.memory_space<vmem>>) attributes {dimension_semantics = [#tpu.dimension_semantics<parallel>], iteration_bounds = array<i64: 1>, scalar_prefetch = 0 : i64, scratch_operands = 0 : i64, tpu.core_type = #tpu.core_type<tc>, window_params = [{transform_indices = @transform_0, window_bounds = array<i64: 16, 128>}, {pipeline_mode = #tpu.pipeline_mode<synchronous>, transform_indices = @transform_1, window_bounds = array<i64: 128, 128>}, {pipeline_mode = #tpu.pipeline_mode<synchronous>, transform_indices = @transform_2, window_bounds = array<i64: 1, 128>}, {pipeline_mode = #tpu.pipeline_mode<synchronous>, transform_indices = @transform_3, window_bounds = array<i64: 128, 128>}, {pipeline_mode = #tpu.pipeline_mode<synchronous>, transform_indices = @transform_4, window_bounds = array<i64: 1, 128>}, {transform_indices = @transform_5, window_bounds = array<i64: 16, 128>}]} {
    %c0 = arith.constant 0 : index
    %c0_0 = arith.constant 0 : index
    %0 = vector.load %arg1[%c0, %c0_0] : memref<16x128xf32, #tpu.memory_space<vmem>>, vector<16x128xf32>
    %c0_1 = arith.constant 0 : index
    %c0_2 = arith.constant 0 : index
    %1 = vector.load %arg2[%c0_1, %c0_2] : memref<128x128xf32, #tpu.memory_space<vmem>>, vector<128x128xf32>
    %cst = arith.constant dense<0.000000e+00> : vector<16x128xf32>
    %2 = tpu.matmul %0, %1, %cst {dimension_numbers = #tpu.dot_dimension_numbers<[1], [0], [0], [1], [0, 0, 1, 1], [], []>} : vector<16x128xf32>, vector<128x128xf32>, vector<16x128xf32> -> vector<16x128xf32>
    %c0_3 = arith.constant 0 : index
    %c0_4 = arith.constant 0 : index
    %3 = vector.load %arg3[%c0_3, %c0_4] : memref<1x128xf32, #tpu.memory_space<vmem>>, vector<1x128xf32>
    %4 = vector.broadcast %3 : vector<1x128xf32> to vector<16x128xf32>
    %5 = arith.addf %2, %4 : vector<16x128xf32>
    %cst_5 = arith.constant 5.000000e-01 : f32
    %6 = vector.broadcast %cst_5 : f32 to vector<16x128xf32>
    %7 = arith.mulf %6, %5 : vector<16x128xf32>
    %cst_6 = arith.constant 0.707106769 : f32
    %8 = vector.broadcast %cst_6 : f32 to vector<16x128xf32>
    %9 = arith.mulf %5, %8 : vector<16x128xf32>
    %10 = math.erf %9 : vector<16x128xf32>
    %cst_7 = arith.constant 1.000000e+00 : f32
    %11 = vector.broadcast %cst_7 : f32 to vector<16x128xf32>
    %12 = arith.addf %11, %10 : vector<16x128xf32>
    %13 = arith.mulf %7, %12 : vector<16x128xf32>
    %c0_8 = arith.constant 0 : index
    %c0_9 = arith.constant 0 : index
    %14 = vector.load %arg4[%c0_8, %c0_9] : memref<128x128xf32, #tpu.memory_space<vmem>>, vector<128x128xf32>
    %cst_10 = arith.constant dense<0.000000e+00> : vector<16x128xf32>
    %15 = tpu.matmul %13, %14, %cst_10 {dimension_numbers = #tpu.dot_dimension_numbers<[1], [0], [0], [1], [0, 0, 1, 1], [], []>} : vector<16x128xf32>, vector<128x128xf32>, vector<16x128xf32> -> vector<16x128xf32>
    %c0_11 = arith.constant 0 : index
    %c0_12 = arith.constant 0 : index
    %16 = vector.load %arg5[%c0_11, %c0_12] : memref<1x128xf32, #tpu.memory_space<vmem>>, vector<1x128xf32>
    %17 = vector.broadcast %16 : vector<1x128xf32> to vector<16x128xf32>
    %18 = arith.addf %15, %17 : vector<16x128xf32>
    %c0_13 = arith.constant 0 : index
    %c0_14 = arith.constant 0 : index
    %19 = vector.load %arg1[%c0_13, %c0_14] : memref<16x128xf32, #tpu.memory_space<vmem>>, vector<16x128xf32>
    %20 = arith.addf %19, %18 : vector<16x128xf32>
    %c0_15 = arith.constant 0 : index
    %c0_16 = arith.constant 0 : index
    %21 = vector.load %arg6[%c0_15, %c0_16] : memref<16x128xf32, #tpu.memory_space<vmem>>, vector<16x128xf32>
    tpu.vector_store %arg6[%c0_15, %c0_16], %20 {strides = array<i32>} : memref<16x128xf32, #tpu.memory_space<vmem>>, vector<16x128xf32>,
    return
  }
  func.func @transform_0(%arg0: i32) -> (i32, i32) {
    %c0_i32 = arith.constant 0 : i32
    %c0_i32_0 = arith.constant 0 : i32
    return %arg0, %c0_i32 : i32, i32
  }
  func.func @transform_1(%arg0: i32) -> (i32, i32) {
    %c0_i32 = arith.constant 0 : i32
    %c0_i32_0 = arith.constant 0 : i32
    %c0_i32_1 = arith.constant 0 : i32
    return %c0_i32, %c0_i32_0 : i32, i32
  }
  func.func @transform_2(%arg0: i32) -> (i32, i32) {
    %c0_i32 = arith.constant 0 : i32
    %c0_i32_0 = arith.constant 0 : i32
    %c0_i32_1 = arith.constant 0 : i32
    return %c0_i32, %c0_i32_0 : i32, i32
  }
  func.func @transform_3(%arg0: i32) -> (i32, i32) {
    %c0_i32 = arith.constant 0 : i32
    %c0_i32_0 = arith.constant 0 : i32
    %c0_i32_1 = arith.constant 0 : i32
    return %c0_i32, %c0_i32_0 : i32, i32
  }
  func.func @transform_4(%arg0: i32) -> (i32, i32) {
    %c0_i32 = arith.constant 0 : i32
    %c0_i32_0 = arith.constant 0 : i32
    %c0_i32_1 = arith.constant 0 : i32
    return %c0_i32, %c0_i32_0 : i32, i32
  }
  func.func @transform_5(%arg0: i32) -> (i32, i32) {
    %c0_i32 = arith.constant 0 : i32
    %c0_i32_0 = arith.constant 0 : i32
    return %arg0, %c0_i32 : i32, i32
  }
}

module attributes {stable_mosaic.version = 11 : i64} {
  func.func @adapter_kernel(%arg0: i32, %arg1: memref<16x128xf32, #tpu.memory_space<vmem>>, %arg2: memref<128x128xf32, #tpu.memory_space<vmem>>, %arg3: memref<1x128xf32, #tpu.memory_space<vmem>>, %arg4: memref<128x128xf32, #tpu.memory_space<vmem>>, %arg5: memref<1x128xf32, #tpu.memory_space<vmem>>, %arg6: memref<16x128xf32, #tpu.memory_space<vmem>>) attributes {dimension_semantics = [#tpu.dimension_semantics<parallel>], iteration_bounds = array<i64: 1>, scalar_prefetch = 0 : i64, scratch_operands = 0 : i64, tpu.core_type = #tpu.core_type<tc>, window_params = [{transform_indices = @transform_0, window_bounds = array<i64: 16, 128>}, {pipeline_mode = #tpu.pipeline_mode<synchronous>, transform_indices = @transform_1, window_bounds = array<i64: 128, 128>}, {pipeline_mode = #tpu.pipeline_mode<synchronous>, transform_indices = @transform_2, window_bounds = array<i64: 1, 128>}, {pipeline_mode = #tpu.pipeline_mode<synchronous>, transform_indices = @transform_3, window_bounds = array<i64: 128, 128>}, {pipeline_mode = #tpu.pipeline_mode<synchronous>, transform_indices = @transform_4, window_bounds = array<i64: 1, 128>}, {transform_indices = @transform_5, window_bounds = array<i64: 16, 128>}]} {
    %c0 = arith.constant 0 : index
    %c0_0 = arith.constant 0 : index
    %0 = vector.load %arg1[%c0, %c0_0] : memref<16x128xf32, #tpu.memory_space<vmem>>, vector<16x128xf32>
    %c0_1 = arith.constant 0 : index
    %c0_2 = arith.constant 0 : index
    %1 = vector.load %arg2[%c0_1, %c0_2] : memref<128x128xf32, #tpu.memory_space<vmem>>, vector<128x128xf32>
    %cst = arith.constant dense<0.000000e+00> : vector<16x128xf32>
    %2 = tpu.matmul %0, %1, %cst {dimension_numbers = #tpu.dot_dimension_numbers<[1], [0], [0], [1], [0, 0, 1, 1], [], []>} : vector<16x128xf32>, vector<128x128xf32>, vector<16x128xf32> -> vector<16x128xf32>
    %c0_3 = arith.constant 0 : index
    %c0_4 = arith.constant 0 : index
    %3 = vector.load %arg3[%c0_3, %c0_4] : memref<1x128xf32, #tpu.memory_space<vmem>>, vector<1x128xf32>
    %4 = vector.broadcast %3 : vector<1x128xf32> to vector<16x128xf32>
    %5 = arith.addf %2, %4 : vector<16x128xf32>
    %cst_5 = arith.constant 5.000000e-01 : f32
    %6 = vector.broadcast %cst_5 : f32 to vector<16x128xf32>
    %7 = arith.mulf %6, %5 : vector<16x128xf32>
    %cst_6 = arith.constant 0.707106769 : f32
    %8 = vector.broadcast %cst_6 : f32 to vector<16x128xf32>
    %9 = arith.mulf %5, %8 : vector<16x128xf32>
    %10 = math.erf %9 : vector<16x128xf32>
    %cst_7 = arith.constant 1.000000e+00 : f32
    %11 = vector.broadcast %cst_7 : f32 to vector<16x128xf32>
    %12 = arith.addf %11, %10 : vector<16x128xf32>
    %13 = arith.mulf %7, %12 : vector<16x128xf32>
    %c0_8 = arith.constant 0 : index
    %c0_9 = arith.constant 0 : index
    %14 = vector.load %arg4[%c0_8, %c0_9] : memref<128x128xf32, #tpu.memory_space<vmem>>, vector<128x128xf32>
    %cst_10 = arith.constant dense<0.000000e+00> : vector<16x128xf32>
    %15 = tpu.matmul %13, %14, %cst_10 {dimension_numbers = #tpu.dot_dimension_numbers<[1], [0], [0], [1], [0, 0, 1, 1], [], []>} : vector<16x128xf32>, vector<128x128xf32>, vector<16x128xf32> -> vector<16x128xf32>
    %c0_11 = arith.constant 0 : index
    %c0_12 = arith.constant 0 : index
    %16 = vector.load %arg5[%c0_11, %c0_12] : memref<1x128xf32, #tpu.memory_space<vmem>>, vector<1x128xf32>
    %17 = vector.broadcast %16 : vector<1x128xf32> to vector<16x128xf32>
    %18 = arith.addf %15, %17 : vector<16x128xf32>
    %c0_13 = arith.constant 0 : index
    %c0_14 = arith.constant 0 : index
    %19 = vector.load %arg1[%c0_13, %c0_14] : memref<16x128xf32, #tpu.memory_space<vmem>>, vector<16x128xf32>
    %20 = arith.addf %19, %18 : vector<16x128xf32>
    %c0_15 = arith.constant 0 : index
    %c0_16 = arith.constant 0 : index
    %21 = vector.load %arg6[%c0_15, %c0_16] : memref<16x128xf32, #tpu.memory_space<vmem>>, vector<16x128xf32>
    tpu.vector_store %arg6[%c0_15, %c0_16], %20 {strides = array<i32>} : memref<16x128xf32, #tpu.memory_space<vmem>>, vector<16x128xf32>,
    return
  }
  func.func @transform_0(%arg0: i32) -> (i32, i32) {
    %c0_i32 = arith.constant 0 : i32
    %c0_i32_0 = arith.constant 0 : i32
    return %arg0, %c0_i32 : i32, i32
  }
  func.func @transform_1(%arg0: i32) -> (i32, i32) {
    %c0_i32 = arith.constant 0 : i32
    %c0_i32_0 = arith.constant 0 : i32
    %c0_i32_1 = arith.constant 0 : i32
    return %c0_i32, %c0_i32_0 : i32, i32
  }
  func.func @transform_2(%arg0: i32) -> (i32, i32) {
    %c0_i32 = arith.constant 0 : i32
    %c0_i32_0 = arith.constant 0 : i32
    %c0_i32_1 = arith.constant 0 : i32
    return %c0_i32, %c0_i32_0 : i32, i32
  }
  func.func @transform_3(%arg0: i32) -> (i32, i32) {
    %c0_i32 = arith.constant 0 : i32
    %c0_i32_0 = arith.constant 0 : i32
    %c0_i32_1 = arith.constant 0 : i32
    return %c0_i32, %c0_i32_0 : i32, i32
  }
  func.func @transform_4(%arg0: i32) -> (i32, i32) {
    %c0_i32 = arith.constant 0 : i32
    %c0_i32_0 = arith.constant 0 : i32
    %c0_i32_1 = arith.constant 0 : i32
    return %c0_i32, %c0_i32_0 : i32, i32
  }
  func.func @transform_5(%arg0: i32) -> (i32, i32) {
    %c0_i32 = arith.constant 0 : i32
    %c0_i32_0 = arith.constant 0 : i32
    return %arg0, %c0_i32 : i32, i32
  }
}

</mosaic_0001>

<bundles_post_ra>
// kernel: tpu_custom_call.1
= control target key start
LH: loop header
LB: loop body
LE: loop exit
PB: predicated region body
PF: predicated region fallthrough
CT: control target
= control target key end

     0   :  { %10 = vsyncpa [#allocation3], 0  ;;  %s520_s0 = inlined_call_operand.hbm [shape: f32[16,128], index: 0, kind: input, shape index: {}]   ;;  %s521_s1 = inlined_call_operand.hbm [shape: f32[128,128], index: 1, kind: input, shape index: {}]   ;;  %s522_s2 = inlined_call_operand.vmem [shape: f32[1,128], index: 2, kind: input, shape index: {}]   ;;  %s523_s3 = inlined_call_operand.hbm [shape: f32[128,128], index: 3, kind: input, shape index: {}]   ;;  %s524_s4 = inlined_call_operand.vmem [shape: f32[1,128], index: 4, kind: input, shape index: {}]   ;;  %s525_s5 = inlined_call_operand.hbm [shape: f32[16,128], index: 5, kind: output, shape index: {}]  }
   0x1   :  { %11 = vsyncpa [#allocation6], 0 }
   0x2   :  { %12 = vsyncpa [#allocation4], 0  ;;  %s30_s20 = sshll.u32 %s521_s1, 4  ;;  %s416_s21 = smov [#allocation5]   ;;  %s31_s20 = int_to_ptr.hbm [resolvable:$true] %s30_s20 }
   0x3   :  { %s32_s22 = sshll.u32 %s416_s21, 4  ;;  %s17_s25 = sshll.u32 %s520_s0, 4  ;;  %s33_s22 = int_to_ptr.vmem [resolvable:$true] %s32_s22  ;;  %s18_s25 = int_to_ptr.hbm [resolvable:$true] %s17_s25 }
   0x4   :  { %s417_s26 = smov 128   ;;  %s418_s27 = smov 8  }
   0x5   :  { %38 = dma.hbm_to_vmem [thread:$0]  %s31_s20, 2048, %s33_s22, [#allocation6], %s417_s26, %s417_s26, %s418_s27  }
   0x6   :  { %s419_s28 = smov [#allocation2]   ;;  %s45_s1 = sshll.u32 %s523_s3, 4  ;;  %s46_s1 = int_to_ptr.hbm [resolvable:$true] %s45_s1 }
   0x7   :  { %s19_s29 = sshll.u32 %s419_s28, 4  ;;  %s420_s0 = smov [#allocation7]   ;;  %s20_s29 = int_to_ptr.vmem [resolvable:$true] %s19_s29 }
   0x8   :  { %25 = dma.hbm_to_vmem [thread:$0]  %s18_s25, 256, %s20_s29, [#allocation3], %s417_s26, %s417_s26, %s418_s27  }
   0x9   :  { %s47_s7 = sshll.u32 %s420_s0, 4  ;;  %s48_s7 = int_to_ptr.vmem [resolvable:$true] %s47_s7 }
   0xa   :  { %53 = dma.hbm_to_vmem [thread:$0]  %s46_s1, 2048, %s48_s7, [#allocation6], %s417_s26, %s417_s26, %s418_s27  }
   0xb   :  { %410 = dma.done.wait [#allocation3], 256  }
   0xc   :  { %411 = vsyncadd [#allocation3], 4294967040 }
   0xd   :  { %412 = dma.done.wait [#allocation6], 4096  }
   0xe   :  { %413 = vsyncadd [#allocation6], 4294963200  ;;  %v85_v0 = vld [vmem:[#allocation5 + $0x78] sm:$0xff]  ;;  %v84_v1 = vld [vmem:[#allocation5 + $0x70] sm:$0xff]  ;;  %s421_s10 = smov [#allocation8]   ;;  %s254_s14 = sshll.u32 %s525_s5, 4  ;;  %s255_s14 = int_to_ptr.hbm [resolvable:$true] %s254_s14 }
   0xf   :  { %90 = vmatpush.msra.mxu0 %v85_v0  ;;  %270 = vmatpush.msra.mxu2 %v85_v0  ;;  %v83_v2 = vld [vmem:[#allocation5 + $0x68] sm:$0xff]  ;;  %v82_v3 = vld [vmem:[#allocation5 + $0x60] sm:$0xff]  ;;  %v81_v4 = vld [vmem:[#allocation5 + $0x58] sm:$0xff]  ;;  %s252_s11 = sshll.u32 %s421_s10, 4  ;;  %s253_s11 = int_to_ptr.vmem [resolvable:$true] %s252_s11 }
  0x10   :  { %v80_v5 = vld [vmem:[#allocation5 + $0x50] sm:$0xff]  ;;  %v79_v6 = vld [vmem:[#allocation5 + $0x48] sm:$0xff]  ;;  %v78_v7 = vld [vmem:[#allocation5 + $0x40] sm:$0xff] }
  0x11   :  { %91 = vmatpush.msra.mxu0 %v84_v1  ;;  %271 = vmatpush.msra.mxu2 %v84_v1  ;;  %v77_v8 = vld [vmem:[#allocation5 + $0x38] sm:$0xff]  ;;  %v76_v9 = vld [vmem:[#allocation5 + $0x30] sm:$0xff]  ;;  %v75_v10 = vld [vmem:[#allocation5 + $0x28] sm:$0xff] }
  0x12   :  { %v74_v11 = vld [vmem:[#allocation5 + $0x20] sm:$0xff]  ;;  %v73_v12 = vld [vmem:[#allocation5 + $0x18] sm:$0xff]  ;;  %v72_v13 = vld [vmem:[#allocation5 + $0x10] sm:$0xff] }
  0x13   :  { %92 = vmatpush.msra.mxu0 %v83_v2  ;;  %272 = vmatpush.msra.mxu2 %v83_v2  ;;  %v71_v14 = vld [vmem:[#allocation5 + $0x8] sm:$0xff]  ;;  %v70_v15 = vld [vmem:[#allocation5] sm:$0xff]  ;;  %v470_v16 = vld [vmem:[#allocation2] sm:$0xff] }
  0x14   :  { %v472_v17 = vld [vmem:[#allocation2 + $0x8] sm:$0xff]  ;;  %v215_v19 = vld [vmem:[#allocation7 + $0x70] sm:$0xff]  ;;  %v214_v20 = vld [vmem:[#allocation7 + $0x68] sm:$0xff] }
  0x15   :  { %93 = vmatpush.msra.mxu0 %v82_v3  ;;  %273 = vmatpush.msra.mxu2 %v82_v3  ;;  %v216_v18 = vld [vmem:[#allocation7 + $0x78] sm:$0xff]  ;;  %v213_v21 = vld [vmem:[#allocation7 + $0x60] sm:$0xff]  ;;  %v308_v22 = vld [vmem:[%s522_s2] ss:$0 sm:$0xff] }
  0x16   :  { %221 = vmatpush.msra.mxu1 %v216_v18  ;;  %286 = vmatpush.msra.mxu3 %v216_v18  ;;  %v212_v23 = vld [vmem:[#allocation7 + $0x58] sm:$0xff]  ;;  %v211_v25 = vld [vmem:[#allocation7 + $0x50] sm:$0xff]  ;;  %v210_v27 = vld [vmem:[#allocation7 + $0x48] sm:$0xff] }
  0x17   :  { %94 = vmatpush.msra.mxu0 %v81_v4  ;;  %274 = vmatpush.msra.mxu2 %v81_v4  ;;  %v209_v29 = vld [vmem:[#allocation7 + $0x40] sm:$0xff]  ;;  %v208_v30 = vld [vmem:[#allocation7 + $0x38] sm:$0xff]  ;;  %v207_v33 = vld [vmem:[#allocation7 + $0x30] sm:$0xff] }
  0x18   :  { %222 = vmatpush.msra.mxu1 %v215_v19  ;;  %287 = vmatpush.msra.mxu3 %v215_v19  ;;  %v206_v36 = vld [vmem:[#allocation7 + $0x28] sm:$0xff]  ;;  %v205_v39 = vld [vmem:[#allocation7 + $0x20] sm:$0xff]  ;;  %v204_v43 = vld [vmem:[#allocation7 + $0x18] sm:$0xff] }
  0x19   :  { %95 = vmatpush.msra.mxu0 %v80_v5  ;;  %275 = vmatpush.msra.mxu2 %v80_v5  ;;  %v203_v47 = vld [vmem:[#allocation7 + $0x10] sm:$0xff]  ;;  %v202_v52 = vld [vmem:[#allocation7 + $0x8] sm:$0xff]  ;;  %v201_v56 = vld [vmem:[#allocation7] sm:$0xff] }
  0x1a   :  { %223 = vmatpush.msra.mxu1 %v214_v20  ;;  %288 = vmatpush.msra.mxu3 %v214_v20 }
  0x1b   :  { %96 = vmatpush.msra.mxu0 %v79_v6  ;;  %276 = vmatpush.msra.mxu2 %v79_v6 }
  0x1c   :  { %224 = vmatpush.msra.mxu1 %v213_v21  ;;  %289 = vmatpush.msra.mxu3 %v213_v21 }
  0x1d   :  { %97 = vmatpush.msra.mxu0 %v78_v7  ;;  %277 = vmatpush.msra.mxu2 %v78_v7 }
  0x1e   :  { %225 = vmatpush.msra.mxu1 %v212_v23  ;;  %290 = vmatpush.msra.mxu3 %v212_v23 }
  0x1f   :  { %98 = vmatpush.msra.mxu0 %v77_v8  ;;  %278 = vmatpush.msra.mxu2 %v77_v8 }
  0x20   :  { %226 = vmatpush.msra.mxu1 %v211_v25  ;;  %291 = vmatpush.msra.mxu3 %v211_v25 }
  0x21   :  { %99 = vmatpush.msra.mxu0 %v76_v9  ;;  %279 = vmatpush.msra.mxu2 %v76_v9 }
  0x22   :  { %227 = vmatpush.msra.mxu1 %v210_v27  ;;  %292 = vmatpush.msra.mxu3 %v210_v27 }
  0x23   :  { %100 = vmatpush.msra.mxu0 %v75_v10  ;;  %280 = vmatpush.msra.mxu2 %v75_v10 }
  0x24   :  { %228 = vmatpush.msra.mxu1 %v209_v29  ;;  %293 = vmatpush.msra.mxu3 %v209_v29 }
  0x25   :  { %101 = vmatpush.msra.mxu0 %v74_v11  ;;  %281 = vmatpush.msra.mxu2 %v74_v11 }
  0x26   :  { %229 = vmatpush.msra.mxu1 %v208_v30  ;;  %294 = vmatpush.msra.mxu3 %v208_v30 }
  0x27   :  { %102 = vmatpush.msra.mxu0 %v73_v12  ;;  %282 = vmatpush.msra.mxu2 %v73_v12 }
  0x28   :  { %230 = vmatpush.msra.mxu1 %v207_v33  ;;  %295 = vmatpush.msra.mxu3 %v207_v33 }
  0x29   :  { %103 = vmatpush.msra.mxu0 %v72_v13  ;;  %283 = vmatpush.msra.mxu2 %v72_v13 }
  0x2a   :  { %231 = vmatpush.msra.mxu1 %v206_v36  ;;  %296 = vmatpush.msra.mxu3 %v206_v36 }
  0x2b   :  { %104 = vmatpush.msra.mxu0 %v71_v14  ;;  %284 = vmatpush.msra.mxu2 %v71_v14 }
  0x2c   :  { %232 = vmatpush.msra.mxu1 %v205_v39  ;;  %297 = vmatpush.msra.mxu3 %v205_v39 }
  0x2d   :  { %105 = vmatpush.msra.mxu0 %v70_v15  ;;  %285 = vmatpush.msra.mxu2 %v70_v15 }
  0x2e   :  { %106 = vmatmul.f32.vlgmr.msra.gmra.mxu0 %v470_v16  ;;  %109 = vmatmul.f32.vlgmr.msra.gmra.mxu2 %v472_v17 }
  0x2f   :  { %233 = vmatpush.msra.mxu1 %v204_v43  ;;  %298 = vmatpush.msra.mxu3 %v204_v43 }
  0x31   :  { %234 = vmatpush.msra.mxu1 %v203_v47  ;;  %299 = vmatpush.msra.mxu3 %v203_v47 }
  0x33   :  { %235 = vmatpush.msra.mxu1 %v202_v52  ;;  %300 = vmatpush.msra.mxu3 %v202_v52 }
  0x35   :  { %236 = vmatpush.msra.mxu1 %v201_v56  ;;  %301 = vmatpush.msra.mxu3 %v201_v56 }
  0xab   :  { %v107_v24 = vpop.f32.mrf.mxu0 }
  0xac   :  { %v479_v26 = vadd.f32 %v308_v22, %v107_v24 }
  0xae   :  { %v482_v28 = vmul.f32 0.70710677, %v479_v26 }
  0xb0   :  { %v117_v31 = vmul.f32 %v482_v28, %v482_v28 }
  0xb1   :  { %v110_v32 = vpop.f32.mrf.mxu2 }
  0xb2   :  { %v486_v34 = vmin.f32 %v117_v31, 16.0  ;;  %v488_v35 = vadd.f32 %v308_v22, %v110_v32 }
  0xb4   :  { %v119_v37 = vmul.f32 2.1237322e-06, %v486_v34  ;;  %v492_v38 = vmul.f32 0.70710677, %v488_v35  ;;  %v130_v40 = vmul.f32 3.8918573e-05, %v486_v34 }
  0xb6   :  { %v120_v41 = vadd.f32 0.00028619796, %v119_v37  ;;  %v157_v42 = vmul.f32 %v492_v38, %v492_v38  ;;  %v131_v44 = vadd.f32 0.001143296, %v130_v40 }
  0xb8   :  { %v121_v45 = vmul.f32 %v120_v41, %v486_v34  ;;  %v158_v46 = vmin.f32 %v157_v42, 16.0  ;;  %v132_v48 = vmul.f32 %v131_v44, %v486_v34 }
  0xba   :  { %v159_v49 = vmul.f32 2.1237322e-06, %v158_v46  ;;  %v170_v50 = vmul.f32 3.8918573e-05, %v158_v46  ;;  %v122_v51 = vadd.f32 0.0036580483, %v121_v45 }
  0xbb   :  { %v133_v53 = vadd.f32 0.014752088, %v132_v48 }
  0xbc   :  { %v160_v54 = vadd.f32 0.00028619796, %v159_v49  ;;  %v171_v55 = vadd.f32 0.001143296, %v170_v50  ;;  %v123_v60 = vmul.f32 %v122_v51, %v486_v34  ;;  %v113_v49 = vmul.f32 0.5, %v479_v26 }
  0xbd   :  { %v134_v57 = vmul.f32 %v133_v53, %v486_v34 }
  0xbe   :  { %v161_v58 = vmul.f32 %v160_v54, %v158_v46  ;;  %v172_v59 = vmul.f32 %v171_v55, %v158_v46  ;;  %v124_v2 = vadd.f32 0.05243302, %v123_v60  ;;  %v114_v55 = vmul.f32 0.5, %v488_v35 }
  0xbf   :  { %v135_v61 = vadd.f32 0.112945676, %v134_v57 }
  0xc0   :  { %v162_v62 = vadd.f32 0.0036580483, %v161_v58  ;;  %v173_v63 = vadd.f32 0.014752088, %v172_v59  ;;  %v125_v8 = vmul.f32 %v124_v2, %v486_v34  ;;  %v309_v58 = vld [vmem:[%s524_s4] ss:$0 sm:$0xff] }
  0xc1   :  { %v136_v0 = vmul.f32 %v135_v61, %v486_v34 }
  0xc2   :  { %v174_v1 = vmul.f32 %v173_v63, %v158_v46  ;;  %v163_v4 = vmul.f32 %v162_v62, %v158_v46  ;;  %v126_v13 = vadd.f32 0.18741608, %v125_v8 }
  0xc3   :  { %v137_v3 = vadd.f32 0.4994258, %v136_v0 }
  0xc4   :  { %v175_v5 = vadd.f32 0.112945676, %v174_v1  ;;  %v164_v10 = vadd.f32 0.05243302, %v163_v4  ;;  %v127_v19 = vmul.f32 %v126_v13, %v486_v34 }
  0xc5   :  { %v138_v6 = vmul.f32 %v137_v3, %v486_v34 }
  0xc6   :  { %v176_v7 = vmul.f32 %v175_v5, %v158_v46  ;;  %v165_v14 = vmul.f32 %v164_v10, %v158_v46  ;;  %v128_v23 = vadd.f32 1.1283791, %v127_v19 }
  0xc7   :  { %v139_v9 = vadd.f32 1.0, %v138_v6 }
  0xc8   :  { %v177_v11 = vadd.f32 0.4994258, %v176_v7  ;;  %v166_v20 = vadd.f32 0.18741608, %v165_v14  ;;  %v129_v33 = vmul.f32 %v128_v23, %v482_v28 }
  0xc9   :  { %310 = vrcp.f32 %v139_v9  ;;  %v151_v24 = vand.u32 2147483648, %v139_v9  ;;  %v149_v30 = vand.u32 2147483647, %v139_v9  ;;  %vm145_vm1 = vweird.f32 %v139_v9 }
  0xca   :  { %v178_v12 = vmul.f32 %v177_v11, %v158_v46  ;;  %v167_v27 = vmul.f32 %v166_v20, %v158_v46 }
  0xcb   :  { %v152_v36 = vor.u32 1.1754944e-38, %v151_v24  ;;  %vm150_vm3 = vcmp.eq.f32.partialorder %v149_v30, 8.507059e+37 }
  0xcc   :  { %v179_v15 = vadd.f32 1.0, %v178_v12  ;;  %v168_v39 = vadd.f32 1.1283791, %v167_v27 }
  0xce   :  { %312 = vrcp.f32 %v179_v15  ;;  %v191_v40 = vand.u32 2147483648, %v179_v15  ;;  %v189_v43 = vand.u32 2147483647, %v179_v15  ;;  %vm185_vm5 = vweird.f32 %v179_v15 }
  0xcf   :  { %v311_v18 = vpop.eup %310  ;;  %v169_v48 = vmul.f32 %v168_v39, %v492_v38 }
  0xd0   :  { %v141_v21 = vmul.f32 %v311_v18, %v139_v9  ;;  %vm146_vm0 = vweird.f32 %v311_v18  ;;  %v192_v47 = vor.u32 1.1754944e-38, %v191_v40  ;;  %vm190_vm7 = vcmp.eq.f32.partialorder %v189_v43, 8.507059e+37 }
  0xd1   :  { %vm147_vm2 = vmor %vm145_vm1, %vm146_vm0 }
  0xd2   :  { %v142_v22 = vsub.f32 1.0, %v141_v21 }
  0xd4   :  { %v313_v25 = vpop.eup %312  ;;  %v143_v29 = vmul.f32 %v311_v18, %v142_v22 }
  0xd5   :  { %v181_v31 = vmul.f32 %v313_v25, %v179_v15  ;;  %vm186_vm4 = vweird.f32 %v313_v25 }
  0xd6   :  { %v144_v32 = vadd.f32 %v311_v18, %v143_v29  ;;  %vm187_vm6 = vmor %vm185_vm5, %vm186_vm4 }
  0xd7   :  { %v182_v37 = vsub.f32 1.0, %v181_v31 }
  0xd8   :  { %v148_v34 = vsel %vm147_vm2, %v311_v18, %v144_v32 }
  0xd9   :  { %v153_v41 = vsel %vm150_vm3, %v152_v36, %v148_v34  ;;  %v183_v42 = vmul.f32 %v313_v25, %v182_v37 }
  0xda   :  { %v154_v44 = vmul.f32 %v153_v41, %v129_v33 }
  0xdb   :  { %v184_v45 = vadd.f32 %v313_v25, %v183_v42 }
  0xdc   :  { %v268_v46 = vclamps-f32 %v154_v44, 1.0 }
  0xdd   :  { %v188_v28 = vsel %vm187_vm6, %v313_v25, %v184_v45 }
  0xde   :  { %v197_v50 = vadd.f32 1.0, %v268_v46  ;;  %v193_v51 = vsel %vm190_vm7, %v192_v47, %v188_v28 }
  0xdf   :  { %v194_v52 = vmul.f32 %v193_v51, %v169_v48 }
  0xe0   :  { %v199_v53 = vmul.f32 %v197_v50, %v113_v49 }
  0xe1   :  { %v269_v54 = vclamps-f32 %v194_v52, 1.0 }
  0xe2   :  { %237 = vmatmul.f32.vlgmr.msra.gmra.mxu1 %v199_v53 }
  0xe3   :  { %v198_v56 = vadd.f32 1.0, %v269_v54 }
  0xe5   :  { %v200_v57 = vmul.f32 %v198_v56, %v114_v55 }
  0xe7   :  { %240 = vmatmul.f32.vlgmr.msra.gmra.mxu3 %v200_v57 }
 0x15f   :  { %v238_v38 = vpop.f32.mrf.mxu1 }
 0x160   :  { %v239_v59 = vadd.f32 %v309_v58, %v238_v38 }
 0x162   :  { %v244_v60 = vadd.f32 %v239_v59, %v470_v16 }
 0x164   :  { %246 = vst [vmem:[#allocation8] sm:$0xff] %v244_v60 }
 0x16a   :  { %v241_v26 = vpop.f32.mrf.mxu3 }
 0x16b   :  { %v242_v35 = vadd.f32 %v309_v58, %v241_v26 }
 0x16d   :  { %v245_v61 = vadd.f32 %v242_v35, %v472_v17 }
 0x16f   :  { %247 = vst [vmem:[#allocation8 + $0x8] sm:$0xff] %v245_v61 }
 0x170   :  { %260 = dma.vmem_to_hbm [thread:$0]  %s253_s11, 256, %s255_s14, [#allocation4], %s417_s26, %s417_s26, %s418_s27  }
 0x171   :  { %414 = dma.done.wait [#allocation4], 256  }
 0x172   :  { %415 = vsyncadd [#allocation4], 4294967040 }
 0x173   :  { %265 = vsyncpa [#allocation3], 1 }
 0x174   :  { %266 = vsyncpa [#allocation6], 1 }
 0x175   :  { %267 = vsyncpa [#allocation4], 1 }

// kernel: tpu_custom_call.1
= control target key start
LH: loop header
LB: loop body
LE: loop exit
PB: predicated region body
PF: predicated region fallthrough
CT: control target
= control target key end

     0   :  { %10 = vsyncpa [#allocation3], 0  ;;  %s520_s0 = inlined_call_operand.hbm [shape: f32[16,128], index: 0, kind: input, shape index: {}]   ;;  %s521_s1 = inlined_call_operand.hbm [shape: f32[128,128], index: 1, kind: input, shape index: {}]   ;;  %s522_s2 = inlined_call_operand.vmem [shape: f32[1,128], index: 2, kind: input, shape index: {}]   ;;  %s523_s3 = inlined_call_operand.hbm [shape: f32[128,128], index: 3, kind: input, shape index: {}]   ;;  %s524_s4 = inlined_call_operand.vmem [shape: f32[1,128], index: 4, kind: input, shape index: {}]   ;;  %s525_s5 = inlined_call_operand.hbm [shape: f32[16,128], index: 5, kind: output, shape index: {}]  }
   0x1   :  { %11 = vsyncpa [#allocation6], 0 }
   0x2   :  { %12 = vsyncpa [#allocation4], 0  ;;  %s30_s20 = sshll.u32 %s521_s1, 4  ;;  %s416_s21 = smov [#allocation5]   ;;  %s31_s20 = int_to_ptr.hbm [resolvable:$true] %s30_s20 }
   0x3   :  { %s32_s22 = sshll.u32 %s416_s21, 4  ;;  %s17_s25 = sshll.u32 %s520_s0, 4  ;;  %s33_s22 = int_to_ptr.vmem [resolvable:$true] %s32_s22  ;;  %s18_s25 = int_to_ptr.hbm [resolvable:$true] %s17_s25 }
   0x4   :  { %s417_s26 = smov 128   ;;  %s418_s27 = smov 8  }
   0x5   :  { %38 = dma.hbm_to_vmem [thread:$0]  %s31_s20, 2048, %s33_s22, [#allocation6], %s417_s26, %s417_s26, %s418_s27  }
   0x6   :  { %s419_s28 = smov [#allocation2]   ;;  %s45_s1 = sshll.u32 %s523_s3, 4  ;;  %s46_s1 = int_to_ptr.hbm [resolvable:$true] %s45_s1 }
   0x7   :  { %s19_s29 = sshll.u32 %s419_s28, 4  ;;  %s420_s0 = smov [#allocation7]   ;;  %s20_s29 = int_to_ptr.vmem [resolvable:$true] %s19_s29 }
   0x8   :  { %25 = dma.hbm_to_vmem [thread:$0]  %s18_s25, 256, %s20_s29, [#allocation3], %s417_s26, %s417_s26, %s418_s27  }
   0x9   :  { %s47_s7 = sshll.u32 %s420_s0, 4  ;;  %s48_s7 = int_to_ptr.vmem [resolvable:$true] %s47_s7 }
   0xa   :  { %53 = dma.hbm_to_vmem [thread:$0]  %s46_s1, 2048, %s48_s7, [#allocation6], %s417_s26, %s417_s26, %s418_s27  }
   0xb   :  { %410 = dma.done.wait [#allocation3], 256  }
   0xc   :  { %411 = vsyncadd [#allocation3], 4294967040 }
   0xd   :  { %412 = dma.done.wait [#allocation6], 4096  }
   0xe   :  { %413 = vsyncadd [#allocation6], 4294963200  ;;  %v85_v0 = vld [vmem:[#allocation5 + $0x78] sm:$0xff]  ;;  %v84_v1 = vld [vmem:[#allocation5 + $0x70] sm:$0xff]  ;;  %s421_s10 = smov [#allocation8]   ;;  %s254_s14 = sshll.u32 %s525_s5, 4  ;;  %s255_s14 = int_to_ptr.hbm [resolvable:$true] %s254_s14 }
   0xf   :  { %90 = vmatpush.msra.mxu0 %v85_v0  ;;  %270 = vmatpush.msra.mxu2 %v85_v0  ;;  %v83_v2 = vld [vmem:[#allocation5 + $0x68] sm:$0xff]  ;;  %v82_v3 = vld [vmem:[#allocation5 + $0x60] sm:$0xff]  ;;  %v81_v4 = vld [vmem:[#allocation5 + $0x58] sm:$0xff]  ;;  %s252_s11 = sshll.u32 %s421_s10, 4  ;;  %s253_s11 = int_to_ptr.vmem [resolvable:$true] %s252_s11 }
  0x10   :  { %v80_v5 = vld [vmem:[#allocation5 + $0x50] sm:$0xff]  ;;  %v79_v6 = vld [vmem:[#allocation5 + $0x48] sm:$0xff]  ;;  %v78_v7 = vld [vmem:[#allocation5 + $0x40] sm:$0xff] }
  0x11   :  { %91 = vmatpush.msra.mxu0 %v84_v1  ;;  %271 = vmatpush.msra.mxu2 %v84_v1  ;;  %v77_v8 = vld [vmem:[#allocation5 + $0x38] sm:$0xff]  ;;  %v76_v9 = vld [vmem:[#allocation5 + $0x30] sm:$0xff]  ;;  %v75_v10 = vld [vmem:[#allocation5 + $0x28] sm:$0xff] }
  0x12   :  { %v74_v11 = vld [vmem:[#allocation5 + $0x20] sm:$0xff]  ;;  %v73_v12 = vld [vmem:[#allocation5 + $0x18] sm:$0xff]  ;;  %v72_v13 = vld [vmem:[#allocation5 + $0x10] sm:$0xff] }
  0x13   :  { %92 = vmatpush.msra.mxu0 %v83_v2  ;;  %272 = vmatpush.msra.mxu2 %v83_v2  ;;  %v71_v14 = vld [vmem:[#allocation5 + $0x8] sm:$0xff]  ;;  %v70_v15 = vld [vmem:[#allocation5] sm:$0xff]  ;;  %v470_v16 = vld [vmem:[#allocation2] sm:$0xff] }
  0x14   :  { %v472_v17 = vld [vmem:[#allocation2 + $0x8] sm:$0xff]  ;;  %v215_v19 = vld [vmem:[#allocation7 + $0x70] sm:$0xff]  ;;  %v214_v20 = vld [vmem:[#allocation7 + $0x68] sm:$0xff] }
  0x15   :  { %93 = vmatpush.msra.mxu0 %v82_v3  ;;  %273 = vmatpush.msra.mxu2 %v82_v3  ;;  %v216_v18 = vld [vmem:[#allocation7 + $0x78] sm:$0xff]  ;;  %v213_v21 = vld [vmem:[#allocation7 + $0x60] sm:$0xff]  ;;  %v308_v22 = vld [vmem:[%s522_s2] ss:$0 sm:$0xff] }
  0x16   :  { %221 = vmatpush.msra.mxu1 %v216_v18  ;;  %286 = vmatpush.msra.mxu3 %v216_v18  ;;  %v212_v23 = vld [vmem:[#allocation7 + $0x58] sm:$0xff]  ;;  %v211_v25 = vld [vmem:[#allocation7 + $0x50] sm:$0xff]  ;;  %v210_v27 = vld [vmem:[#allocation7 + $0x48] sm:$0xff] }
  0x17   :  { %94 = vmatpush.msra.mxu0 %v81_v4  ;;  %274 = vmatpush.msra.mxu2 %v81_v4  ;;  %v209_v29 = vld [vmem:[#allocation7 + $0x40] sm:$0xff]  ;;  %v208_v30 = vld [vmem:[#allocation7 + $0x38] sm:$0xff]  ;;  %v207_v33 = vld [vmem:[#allocation7 + $0x30] sm:$0xff] }
  0x18   :  { %222 = vmatpush.msra.mxu1 %v215_v19  ;;  %287 = vmatpush.msra.mxu3 %v215_v19  ;;  %v206_v36 = vld [vmem:[#allocation7 + $0x28] sm:$0xff]  ;;  %v205_v39 = vld [vmem:[#allocation7 + $0x20] sm:$0xff]  ;;  %v204_v43 = vld [vmem:[#allocation7 + $0x18] sm:$0xff] }
  0x19   :  { %95 = vmatpush.msra.mxu0 %v80_v5  ;;  %275 = vmatpush.msra.mxu2 %v80_v5  ;;  %v203_v47 = vld [vmem:[#allocation7 + $0x10] sm:$0xff]  ;;  %v202_v52 = vld [vmem:[#allocation7 + $0x8] sm:$0xff]  ;;  %v201_v56 = vld [vmem:[#allocation7] sm:$0xff] }
  0x1a   :  { %223 = vmatpush.msra.mxu1 %v214_v20  ;;  %288 = vmatpush.msra.mxu3 %v214_v20 }
  0x1b   :  { %96 = vmatpush.msra.mxu0 %v79_v6  ;;  %276 = vmatpush.msra.mxu2 %v79_v6 }
  0x1c   :  { %224 = vmatpush.msra.mxu1 %v213_v21  ;;  %289 = vmatpush.msra.mxu3 %v213_v21 }
  0x1d   :  { %97 = vmatpush.msra.mxu0 %v78_v7  ;;  %277 = vmatpush.msra.mxu2 %v78_v7 }
  0x1e   :  { %225 = vmatpush.msra.mxu1 %v212_v23  ;;  %290 = vmatpush.msra.mxu3 %v212_v23 }
  0x1f   :  { %98 = vmatpush.msra.mxu0 %v77_v8  ;;  %278 = vmatpush.msra.mxu2 %v77_v8 }
  0x20   :  { %226 = vmatpush.msra.mxu1 %v211_v25  ;;  %291 = vmatpush.msra.mxu3 %v211_v25 }
  0x21   :  { %99 = vmatpush.msra.mxu0 %v76_v9  ;;  %279 = vmatpush.msra.mxu2 %v76_v9 }
  0x22   :  { %227 = vmatpush.msra.mxu1 %v210_v27  ;;  %292 = vmatpush.msra.mxu3 %v210_v27 }
  0x23   :  { %100 = vmatpush.msra.mxu0 %v75_v10  ;;  %280 = vmatpush.msra.mxu2 %v75_v10 }
  0x24   :  { %228 = vmatpush.msra.mxu1 %v209_v29  ;;  %293 = vmatpush.msra.mxu3 %v209_v29 }
  0x25   :  { %101 = vmatpush.msra.mxu0 %v74_v11  ;;  %281 = vmatpush.msra.mxu2 %v74_v11 }
  0x26   :  { %229 = vmatpush.msra.mxu1 %v208_v30  ;;  %294 = vmatpush.msra.mxu3 %v208_v30 }
  0x27   :  { %102 = vmatpush.msra.mxu0 %v73_v12  ;;  %282 = vmatpush.msra.mxu2 %v73_v12 }
  0x28   :  { %230 = vmatpush.msra.mxu1 %v207_v33  ;;  %295 = vmatpush.msra.mxu3 %v207_v33 }
  0x29   :  { %103 = vmatpush.msra.mxu0 %v72_v13  ;;  %283 = vmatpush.msra.mxu2 %v72_v13 }
  0x2a   :  { %231 = vmatpush.msra.mxu1 %v206_v36  ;;  %296 = vmatpush.msra.mxu3 %v206_v36 }
  0x2b   :  { %104 = vmatpush.msra.mxu0 %v71_v14  ;;  %284 = vmatpush.msra.mxu2 %v71_v14 }
  0x2c   :  { %232 = vmatpush.msra.mxu1 %v205_v39  ;;  %297 = vmatpush.msra.mxu3 %v205_v39 }
  0x2d   :  { %105 = vmatpush.msra.mxu0 %v70_v15  ;;  %285 = vmatpush.msra.mxu2 %v70_v15 }
  0x2e   :  { %106 = vmatmul.f32.vlgmr.msra.gmra.mxu0 %v470_v16  ;;  %109 = vmatmul.f32.vlgmr.msra.gmra.mxu2 %v472_v17 }
  0x2f   :  { %233 = vmatpush.msra.mxu1 %v204_v43  ;;  %298 = vmatpush.msra.mxu3 %v204_v43 }
  0x31   :  { %234 = vmatpush.msra.mxu1 %v203_v47  ;;  %299 = vmatpush.msra.mxu3 %v203_v47 }
  0x33   :  { %235 = vmatpush.msra.mxu1 %v202_v52  ;;  %300 = vmatpush.msra.mxu3 %v202_v52 }
  0x35   :  { %236 = vmatpush.msra.mxu1 %v201_v56  ;;  %301 = vmatpush.msra.mxu3 %v201_v56 }
  0xab   :  { %v107_v24 = vpop.f32.mrf.mxu0 }
  0xac   :  { %v479_v26 = vadd.f32 %v308_v22, %v107_v24 }
  0xae   :  { %v482_v28 = vmul.f32 0.70710677, %v479_v26 }
  0xb0   :  { %v117_v31 = vmul.f32 %v482_v28, %v482_v28 }
  0xb1   :  { %v110_v32 = vpop.f32.mrf.mxu2 }
  0xb2   :  { %v486_v34 = vmin.f32 %v117_v31, 16.0  ;;  %v488_v35 = vadd.f32 %v308_v22, %v110_v32 }
  0xb4   :  { %v119_v37 = vmul.f32 2.1237322e-06, %v486_v34  ;;  %v492_v38 = vmul.f32 0.70710677, %v488_v35  ;;  %v130_v40 = vmul.f32 3.8918573e-05, %v486_v34 }
  0xb6   :  { %v120_v41 = vadd.f32 0.00028619796, %v119_v37  ;;  %v157_v42 = vmul.f32 %v492_v38, %v492_v38  ;;  %v131_v44 = vadd.f32 0.001143296, %v130_v40 }
  0xb8   :  { %v121_v45 = vmul.f32 %v120_v41, %v486_v34  ;;  %v158_v46 = vmin.f32 %v157_v42, 16.0  ;;  %v132_v48 = vmul.f32 %v131_v44, %v486_v34 }
  0xba   :  { %v159_v49 = vmul.f32 2.1237322e-06, %v158_v46  ;;  %v170_v50 = vmul.f32 3.8918573e-05, %v158_v46  ;;  %v122_v51 = vadd.f32 0.0036580483, %v121_v45 }
  0xbb   :  { %v133_v53 = vadd.f32 0.014752088, %v132_v48 }
  0xbc   :  { %v160_v54 = vadd.f32 0.00028619796, %v159_v49  ;;  %v171_v55 = vadd.f32 0.001143296, %v170_v50  ;;  %v123_v60 = vmul.f32 %v122_v51, %v486_v34  ;;  %v113_v49 = vmul.f32 0.5, %v479_v26 }
  0xbd   :  { %v134_v57 = vmul.f32 %v133_v53, %v486_v34 }
  0xbe   :  { %v161_v58 = vmul.f32 %v160_v54, %v158_v46  ;;  %v172_v59 = vmul.f32 %v171_v55, %v158_v46  ;;  %v124_v2 = vadd.f32 0.05243302, %v123_v60  ;;  %v114_v55 = vmul.f32 0.5, %v488_v35 }
  0xbf   :  { %v135_v61 = vadd.f32 0.112945676, %v134_v57 }
  0xc0   :  { %v162_v62 = vadd.f32 0.0036580483, %v161_v58  ;;  %v173_v63 = vadd.f32 0.014752088, %v172_v59  ;;  %v125_v8 = vmul.f32 %v124_v2, %v486_v34  ;;  %v309_v58 = vld [vmem:[%s524_s4] ss:$0 sm:$0xff] }
  0xc1   :  { %v136_v0 = vmul.f32 %v135_v61, %v486_v34 }
  0xc2   :  { %v174_v1 = vmul.f32 %v173_v63, %v158_v46  ;;  %v163_v4 = vmul.f32 %v162_v62, %v158_v46  ;;  %v126_v13 = vadd.f32 0.18741608, %v125_v8 }
  0xc3   :  { %v137_v3 = vadd.f32 0.4994258, %v136_v0 }
  0xc4   :  { %v175_v5 = vadd.f32 0.112945676, %v174_v1  ;;  %v164_v10 = vadd.f32 0.05243302, %v163_v4  ;;  %v127_v19 = vmul.f32 %v126_v13, %v486_v34 }
  0xc5   :  { %v138_v6 = vmul.f32 %v137_v3, %v486_v34 }
  0xc6   :  { %v176_v7 = vmul.f32 %v175_v5, %v158_v46  ;;  %v165_v14 = vmul.f32 %v164_v10, %v158_v46  ;;  %v128_v23 = vadd.f32 1.1283791, %v127_v19 }
  0xc7   :  { %v139_v9 = vadd.f32 1.0, %v138_v6 }
  0xc8   :  { %v177_v11 = vadd.f32 0.4994258, %v176_v7  ;;  %v166_v20 = vadd.f32 0.18741608, %v165_v14  ;;  %v129_v33 = vmul.f32 %v128_v23, %v482_v28 }
  0xc9   :  { %310 = vrcp.f32 %v139_v9  ;;  %v151_v24 = vand.u32 2147483648, %v139_v9  ;;  %v149_v30 = vand.u32 2147483647, %v139_v9  ;;  %vm145_vm1 = vweird.f32 %v139_v9 }
  0xca   :  { %v178_v12 = vmul.f32 %v177_v11, %v158_v46  ;;  %v167_v27 = vmul.f32 %v166_v20, %v158_v46 }
  0xcb   :  { %v152_v36 = vor.u32 1.1754944e-38, %v151_v24  ;;  %vm150_vm3 = vcmp.eq.f32.partialorder %v149_v30, 8.507059e+37 }
  0xcc   :  { %v179_v15 = vadd.f32 1.0, %v178_v12  ;;  %v168_v39 = vadd.f32 1.1283791, %v167_v27 }
  0xce   :  { %312 = vrcp.f32 %v179_v15  ;;  %v191_v40 = vand.u32 2147483648, %v179_v15  ;;  %v189_v43 = vand.u32 2147483647, %v179_v15  ;;  %vm185_vm5 = vweird.f32 %v179_v15 }
  0xcf   :  { %v311_v18 = vpop.eup %310  ;;  %v169_v48 = vmul.f32 %v168_v39, %v492_v38 }
  0xd0   :  { %v141_v21 = vmul.f32 %v311_v18, %v139_v9  ;;  %vm146_vm0 = vweird.f32 %v311_v18  ;;  %v192_v47 = vor.u32 1.1754944e-38, %v191_v40  ;;  %vm190_vm7 = vcmp.eq.f32.partialorder %v189_v43, 8.507059e+37 }
  0xd1   :  { %vm147_vm2 = vmor %vm145_vm1, %vm146_vm0 }
  0xd2   :  { %v142_v22 = vsub.f32 1.0, %v141_v21 }
  0xd4   :  { %v313_v25 = vpop.eup %312  ;;  %v143_v29 = vmul.f32 %v311_v18, %v142_v22 }
  0xd5   :  { %v181_v31 = vmul.f32 %v313_v25, %v179_v15  ;;  %vm186_vm4 = vweird.f32 %v313_v25 }
  0xd6   :  { %v144_v32 = vadd.f32 %v311_v18, %v143_v29  ;;  %vm187_vm6 = vmor %vm185_vm5, %vm186_vm4 }
  0xd7   :  { %v182_v37 = vsub.f32 1.0, %v181_v31 }
  0xd8   :  { %v148_v34 = vsel %vm147_vm2, %v311_v18, %v144_v32 }
  0xd9   :  { %v153_v41 = vsel %vm150_vm3, %v152_v36, %v148_v34  ;;  %v183_v42 = vmul.f32 %v313_v25, %v182_v37 }
  0xda   :  { %v154_v44 = vmul.f32 %v153_v41, %v129_v33 }
  0xdb   :  { %v184_v45 = vadd.f32 %v313_v25, %v183_v42 }
  0xdc   :  { %v268_v46 = vclamps-f32 %v154_v44, 1.0 }
  0xdd   :  { %v188_v28 = vsel %vm187_vm6, %v313_v25, %v184_v45 }
  0xde   :  { %v197_v50 = vadd.f32 1.0, %v268_v46  ;;  %v193_v51 = vsel %vm190_vm7, %v192_v47, %v188_v28 }
  0xdf   :  { %v194_v52 = vmul.f32 %v193_v51, %v169_v48 }
  0xe0   :  { %v199_v53 = vmul.f32 %v197_v50, %v113_v49 }
  0xe1   :  { %v269_v54 = vclamps-f32 %v194_v52, 1.0 }
  0xe2   :  { %237 = vmatmul.f32.vlgmr.msra.gmra.mxu1 %v199_v53 }
  0xe3   :  { %v198_v56 = vadd.f32 1.0, %v269_v54 }
  0xe5   :  { %v200_v57 = vmul.f32 %v198_v56, %v114_v55 }
  0xe7   :  { %240 = vmatmul.f32.vlgmr.msra.gmra.mxu3 %v200_v57 }
 0x15f   :  { %v238_v38 = vpop.f32.mrf.mxu1 }
 0x160   :  { %v239_v59 = vadd.f32 %v309_v58, %v238_v38 }
 0x162   :  { %v244_v60 = vadd.f32 %v239_v59, %v470_v16 }
 0x164   :  { %246 = vst [vmem:[#allocation8] sm:$0xff] %v244_v60 }
 0x16a   :  { %v241_v26 = vpop.f32.mrf.mxu3 }
 0x16b   :  { %v242_v35 = vadd.f32 %v309_v58, %v241_v26 }
 0x16d   :  { %v245_v61 = vadd.f32 %v242_v35, %v472_v17 }
 0x16f   :  { %247 = vst [vmem:[#allocation8 + $0x8] sm:$0xff] %v245_v61 }
 0x170   :  { %260 = dma.vmem_to_hbm [thread:$0]  %s253_s11, 256, %s255_s14, [#allocation4], %s417_s26, %s417_s26, %s418_s27  }
 0x171   :  { %414 = dma.done.wait [#allocation4], 256  }
 0x172   :  { %415 = vsyncadd [#allocation4], 4294967040 }
 0x173   :  { %265 = vsyncpa [#allocation3], 1 }
 0x174   :  { %266 = vsyncpa [#allocation6], 1 }
 0x175   :  { %267 = vsyncpa [#allocation4], 1 }

</bundles_post_ra>
